<compile_context>
chip_gen: v6e
topology: v6e:2x2x1
jax: 0.10.0
libtpu: 0.0.40
codegen_flags: <defaults>
</compile_context>

<pallas_src>
import functools

import jax
import jax.numpy as jnp
from jax import lax
from jax.experimental import pallas as pl
from jax.experimental.pallas import tpu as pltpu

EPS = 1e-5          # nn.InstanceNorm2d default eps
NEG_SLOPE = 0.01    # nn.LeakyReLU default negative_slope


def _leaky(x):
    return jnp.where(x > 0, x, NEG_SLOPE * x)


def _resblock_kernel(x_ref,      # (B_tile*H, W*Cin)   lane-dense input rows
                     w1_ref,     # (3*W*Cin,  W*Cout)  K-stacked banded conv1 weights
                     w2_ref,     # (3*W*Cout, W*Cout)  K-stacked banded conv2 weights
                     w3_ref,     # (W*Cin,    W*Cout)  block-diagonal 1x1 shortcut conv
                     p_ref,      # (5, W*Cout)         g1, be1, g2, be2, b3 (tiled over W)
                     out_ref,    # (B_tile*H, W*Cout)
                     *, b_tile, h, cout, inv_hw, roll_shifts):
    M, WC = out_ref.shape

    x = x_ref[...]
    pr = p_ref[...]

    # Per-image row masks (row % h) so the vertical halo never crosses images.
    row = lax.broadcasted_iota(jnp.int32, (M, 1), 0) % h
    not_top = row >= 1           # rows that receive the "row above" tap
    not_bot = row <= h - 2       # rows that receive the "row below" tap

    if roll_shifts is None:
        # Fallback (W not a power of two): synthesize the channel gather matrix
        # in-kernel from iotas -- never shipped from HBM.
        rr = lax.broadcasted_iota(jnp.int32, (WC, WC), 0) % cout
        cc = lax.broadcasted_iota(jnp.int32, (WC, WC), 1) % cout
        gmat = (rr == cc).astype(jnp.float32)

    def conv3x3(inp, w_ref):
        # Three vertical taps fused along K into one MXU matmul.  Horizontal
        # taps + horizontal zero-pad live inside the banded weights; the
        # vertical halo is an XLU roll + row mask on the (narrow) input side.
        up = jnp.where(not_top, pltpu.roll(inp, shift=1, axis=0), 0.0)      # x[h-1]
        dn = jnp.where(not_bot, pltpu.roll(inp, shift=M - 1, axis=0), 0.0)  # x[h+1]
        xin = jnp.concatenate([up, inp, dn], axis=-1)                       # (M, 3K)
        return jnp.dot(xin, w_ref[...], preferred_element_type=jnp.float32)

    def inorm(y, gamma_row, beta_row):
        # Per-image statistics: segment reduce over H, then reduce across the W
        # channel groups packed into the lane axis with log2(W) lane-rolls.
        y3 = y.reshape(b_tile, h, WC)
        st = jnp.concatenate(
            [jnp.sum(y3, axis=1), jnp.sum(y3 * y3, axis=1)], axis=0)  # (2*b_tile, WC)
        if roll_shifts is None:
            st = jnp.dot(st, gmat, preferred_element_type=jnp.float32)
        else:
            for s in roll_shifts:
                st = st + pltpu.roll(st, shift=s, axis=1)
        mean = st[:b_tile] * inv_hw
        # Single-pass variance; fine while |mean| is not >> std (true here: the
        # IN-cancelled conv biases were removed and inputs are ~zero-mean).
        var = st[b_tile:] * inv_hw - mean * mean
        scale = gamma_row * lax.rsqrt(var + EPS)          # gamma folded into rsqrt
        shift = beta_row - mean * scale
        return (y3 * scale[:, None, :] + shift[:, None, :]).reshape(M, WC)

    # conv1 (bias dropped: cancelled by IN) + IN1 + LeakyReLU
    y = _leaky(inorm(conv3x3(x, w1_ref), pr[0:1], pr[1:2]))
    # conv2 (bias dropped) + IN2
    y2 = inorm(conv3x3(y, w2_ref), pr[2:3], pr[3:4])
    # 1x1 shortcut conv on the original lane-dense input + residual + act
    shortcut = jnp.dot(x, w3_ref[...], preferred_element_type=jnp.float32) + pr[4:5]
    out_ref[...] = _leaky(y2 + shortcut)


def _banded_conv_weights(w, W):
    """w: (3, 3, Cin, Cout) HWIO -> (3*W*Cin, W*Cout) K-stacked band matrices.

    For vertical tap kh: Band[kh][wi*Cin+ci, wo*Cout+co] = w[kh, kw, ci, co]
    with kw = wi - wo + 1 (zero outside 0..2), which also encodes the
    horizontal zero-padding.  The three taps are stacked along K so the conv is
    a single matmul against [x[h-1], x[h], x[h+1]].
    """
    taps = []
    for kh in range(3):
        acc = None
        for kw in range(3):
            band = jnp.kron(jnp.eye(W, k=1 - kw, dtype=w.dtype), w[kh, kw])
            acc = band if acc is None else acc + band
        taps.append(acc)
    return jnp.concatenate(taps, axis=0)


def basic_res_block_pallas(x_nchw, params, target_rows=256):
    """x_nchw: (N, Cin, H, W) float32.  Returns (N, Cout, H, W)."""
    (w1, b1, g1, be1, w2, b2, g2, be2, w3, b3) = params
    del b1, b2  # cancelled exactly by the InstanceNorm mean subtraction
    N, Cin, H, W = x_nchw.shape
    Cout = w1.shape[-1]
    WCin, WCout = W * Cin, W * Cout

    # Batch tile: fold images into the matmul M dimension (M = B_tile*H),
    # targeting >=128 rows; B_tile divides N so no remainder handling needed.
    b_cap = min(N, max(1, target_rows // H))
    b_tile = next(b for b in range(b_cap, 0, -1) if N % b == 0)
    Mb = b_tile * H
    grid = (N // b_tile,)

    # Layout glue: NCHW -> (N*H, W*Cin), channels fastest on the lane axis.
    # TODO(synk): accept/emit this lane-dense layout directly from neighboring
    # layers to avoid the two wrapper transposes at realistic sizes.
    x_rows = jnp.transpose(x_nchw, (0, 2, 3, 1)).reshape(N * H, WCin)

    # Weight reformatting (static per layer in a real network).
    w1s = _banded_conv_weights(w1, W)                               # (3*WCin, WCout)
    w2s = _banded_conv_weights(w2, W)                               # (3*WCout, WCout)
    w3b = jnp.kron(jnp.eye(W, dtype=w3.dtype), w3)                  # (WCin, WCout)
    prow = jnp.stack([jnp.tile(v.astype(jnp.float32), W)
                      for v in (g1, be1, g2, be2, b3)], axis=0)     # (5, WCout)

    # log2(W) circular lane-roll shifts for the channel-group reduce (W pow2),
    # else None -> in-kernel iota gather matrix.
    roll_shifts = (tuple(Cout << k for k in range((W - 1).bit_length()))
                   if (W & (W - 1)) == 0 else None)

    def const_spec(a):
        return pl.BlockSpec(a.shape, lambda i, _nd=a.ndim: (0,) * _nd)

    flops = (2 * N * H * (3 * WCin * WCout + 3 * WCout * WCout + WCin * WCout)
             + 12 * N * H * WCout)
    bytes_accessed = 4 * (x_rows.size + N * H * WCout
                          + w1s.size + w2s.size + w3b.size + prow.size)
    cost = pl.CostEstimate(flops=flops, transcendentals=2 * N * WCout,
                           bytes_accessed=bytes_accessed)

    out = pl.pallas_call(
        functools.partial(_resblock_kernel, b_tile=b_tile, h=H, cout=Cout,
                          inv_hw=1.0 / float(H * W), roll_shifts=roll_shifts),
        out_shape=jax.ShapeDtypeStruct((N * H, WCout), jnp.float32),
        grid_spec=pltpu.PrefetchScalarGridSpec(
            num_scalar_prefetch=0,
            grid=grid,
            in_specs=[
                pl.BlockSpec((Mb, WCin), lambda i: (i, 0)),
                const_spec(w1s), const_spec(w2s), const_spec(w3b), const_spec(prow),
            ],
            out_specs=pl.BlockSpec((Mb, WCout), lambda i: (i, 0)),
        ),
        compiler_params=pltpu.CompilerParams(dimension_semantics=("parallel",)),
        cost_estimate=cost,
    )(x_rows, w1s, w2s, w3b, prow)

    # Un-flatten the lane axis back to (W, Cout) and return NCHW.
    return jnp.transpose(out.reshape(N, H, W, Cout), (0, 3, 1, 2))


def basic_res_block_reference(x_nchw, params):
    """Pure-JAX reference mirroring the PyTorch forward (biases included)."""
    (w1, b1, g1, be1, w2, b2, g2, be2, w3, b3) = params
    x = jnp.transpose(x_nchw, (0, 2, 3, 1))

    def conv(x, w, b):
        y = lax.conv_general_dilated(x, w, (1, 1), "SAME",
                                     dimension_numbers=("NHWC", "HWIO", "NHWC"))
        return y + b

    def inorm(y, g, be):
        m = jnp.mean(y, axis=(1, 2), keepdims=True)
        v = jnp.mean((y - m) ** 2, axis=(1, 2), keepdims=True)
        return (y - m) * lax.rsqrt(v + EPS) * g + be

    y = conv(x, w1, b1)
    y = _leaky(inorm(y, g1, be1))
    y = inorm(conv(y, w2, b2), g2, be2)
    shortcut = jnp.einsum("nhwc,cd->nhwd", x, w3) + b3
    out = _leaky(y + shortcut)
    return jnp.transpose(out, (0, 3, 1, 2))


if __name__ == "__main__":
    # Conv2d / InstanceNorm2d(affine=True) / LeakyReLU, use_1x1conv=True,
    # kernel_size=3, padding=1, stride=1.   W * Cout = 128 -> lane-dense output.
    N, Cin, Cout, H, W = 2, 4, 8, 16, 16

    key = jax.random.PRNGKey(0)
    keys = jax.random.split(key, 12)
    scale = 0.1
    w1 = scale * jax.random.normal(keys[0], (3, 3, Cin, Cout), jnp.float32)
    b1 = scale * jax.random.normal(keys[1], (Cout,), jnp.float32)
    g1 = 1.0 + scale * jax.random.normal(keys[2], (Cout,), jnp.float32)
    be1 = scale * jax.random.normal(keys[3], (Cout,), jnp.float32)
    w2 = scale * jax.random.normal(keys[4], (3, 3, Cout, Cout), jnp.float32)
    b2 = scale * jax.random.normal(keys[5], (Cout,), jnp.float32)
    g2 = 1.0 + scale * jax.random.normal(keys[6], (Cout,), jnp.float32)
    be2 = scale * jax.random.normal(keys[7], (Cout,), jnp.float32)
    w3 = scale * jax.random.normal(keys[8], (Cin, Cout), jnp.float32)
    b3 = scale * jax.random.normal(keys[9], (Cout,), jnp.float32)
    params = (w1, b1, g1, be1, w2, b2, g2, be2, w3, b3)

    x = jax.random.normal(keys[10], (N, Cin, H, W), jnp.float32)

    out = basic_res_block_pallas(x, params)
    out = jax.block_until_ready(out)

    ref = jax.block_until_ready(basic_res_block_reference(x, params))
    assert out.shape == (N, Cout, H, W)
    assert jnp.allclose(out, ref, rtol=1e-3, atol=1e-3), float(jnp.max(jnp.abs(out - ref)))

    print("KERNEL_OK")
</pallas_src>

<mosaic_0001>
module attributes {stable_mosaic.version = 11 : i64} {
  func.func @_resblock_kernel(%arg0: i32, %arg1: memref<32x64xf32, #tpu.memory_space<vmem>>, %arg2: memref<192x128xf32, #tpu.memory_space<vmem>>, %arg3: memref<384x128xf32, #tpu.memory_space<vmem>>, %arg4: memref<64x128xf32, #tpu.memory_space<vmem>>, %arg5: memref<5x128xf32, #tpu.memory_space<vmem>>, %arg6: memref<32x128xf32, #tpu.memory_space<vmem>>) attributes {dimension_semantics = [#tpu.dimension_semantics<parallel>], iteration_bounds = array<i64: 1>, scalar_prefetch = 0 : i64, scratch_operands = 0 : i64, tpu.core_type = #tpu.core_type<tc>, window_params = [{transform_indices = @transform_0, window_bounds = array<i64: 32, 64>}, {pipeline_mode = #tpu.pipeline_mode<synchronous>, transform_indices = @transform_1, window_bounds = array<i64: 192, 128>}, {pipeline_mode = #tpu.pipeline_mode<synchronous>, transform_indices = @transform_2, window_bounds = array<i64: 384, 128>}, {pipeline_mode = #tpu.pipeline_mode<synchronous>, transform_indices = @transform_3, window_bounds = array<i64: 64, 128>}, {pipeline_mode = #tpu.pipeline_mode<synchronous>, transform_indices = @transform_4, window_bounds = array<i64: 5, 128>}, {transform_indices = @transform_5, window_bounds = array<i64: 32, 128>}]} {
    %c0 = arith.constant 0 : index
    %c0_0 = arith.constant 0 : index
    %0 = vector.load %arg1[%c0, %c0_0] : memref<32x64xf32, #tpu.memory_space<vmem>>, vector<32x64xf32>
    %c0_1 = arith.constant 0 : index
    %c0_2 = arith.constant 0 : index
    %1 = vector.load %arg5[%c0_1, %c0_2] : memref<5x128xf32, #tpu.memory_space<vmem>>, vector<5x128xf32>
    %2 = tpu.iota {dimensions = array<i32: 0>} : vector<32x1xi32>
    %c16_i32 = arith.constant 16 : i32
    %c0_i32 = arith.constant 0 : i32
    %3 = arith.cmpi eq, %c16_i32, %c0_i32 : i32
    %c1_i32 = arith.constant 1 : i32
    %4 = arith.select %3, %c1_i32, %c16_i32 : i32
    %5 = vector.broadcast %4 : i32 to vector<32x1xi32>
    %6 = arith.remsi %2, %5 : vector<32x1xi32>
    %c0_i32_3 = arith.constant 0 : i32
    %7 = vector.broadcast %c0_i32_3 : i32 to vector<32x1xi32>
    %8 = arith.cmpi ne, %6, %7 : vector<32x1xi32>
    %c0_i32_4 = arith.constant 0 : i32
    %9 = vector.broadcast %c0_i32_4 : i32 to vector<32x1xi32>
    %10 = arith.cmpi slt, %6, %9 : vector<32x1xi32>
    %c0_i32_5 = arith.constant 0 : i32
    %11 = arith.cmpi slt, %4, %c0_i32_5 : i32
    %12 = vector.broadcast %11 : i1 to vector<32x1xi1>
    %13 = vector.broadcast %12 : vector<32x1xi1> to vector<32x1xi1>
    %14 = arith.xori %10, %13 : vector<32x1xi1>
    %15 = arith.andi %14, %8 : vector<32x1xi1>
    %16 = vector.broadcast %4 : i32 to vector<32x1xi32>
    %17 = arith.addi %6, %16 : vector<32x1xi32>
    %18 = arith.select %15, %17, %6 : vector<32x1xi1>, vector<32x1xi32>
    %c1_i32_6 = arith.constant 1 : i32
    %19 = vector.broadcast %c1_i32_6 : i32 to vector<32x1xi32>
    %20 = arith.cmpi sge, %18, %19 : vector<32x1xi32>
    %c14_i32 = arith.constant 14 : i32
    %21 = vector.broadcast %c14_i32 : i32 to vector<32x1xi32>
    %22 = arith.cmpi sle, %18, %21 : vector<32x1xi32>
    %c1_i32_7 = arith.constant 1 : i32
    %23 = tpu.dynamic_rotate %0 by %c1_i32_7 dim 0 : vector<32x64xf32>, i32 -> vector<32x64xf32>
    %cst = arith.constant 0.000000e+00 : f32
    %24 = vector.shape_cast %20 : vector<32x1xi1> to vector<32x1xi1>
    %25 = vector.broadcast %24 : vector<32x1xi1> to vector<32x64xi1>
    %26 = vector.broadcast %cst : f32 to vector<32x64xf32>
    %27 = arith.select %25, %23, %26 : vector<32x64xi1>, vector<32x64xf32>
    %c31_i32 = arith.constant 31 : i32
    %28 = tpu.dynamic_rotate %0 by %c31_i32 dim 0 : vector<32x64xf32>, i32 -> vector<32x64xf32>
    %cst_8 = arith.constant 0.000000e+00 : f32
    %29 = vector.shape_cast %22 : vector<32x1xi1> to vector<32x1xi1>
    %30 = vector.broadcast %29 : vector<32x1xi1> to vector<32x64xi1>
    %31 = vector.broadcast %cst_8 : f32 to vector<32x64xf32>
    %32 = arith.select %30, %28, %31 : vector<32x64xi1>, vector<32x64xf32>
    %33 = tpu.concatenate %27, %0, %32 in 1 : vector<32x64xf32>, vector<32x64xf32>, vector<32x64xf32> -> vector<32x192xf32>
    %c0_9 = arith.constant 0 : index
    %c0_10 = arith.constant 0 : index
    %34 = vector.load %arg2[%c0_9, %c0_10] : memref<192x128xf32, #tpu.memory_space<vmem>>, vector<192x128xf32>
    %cst_11 = arith.constant dense<0.000000e+00> : vector<32x128xf32>
    %35 = tpu.matmul %33, %34, %cst_11 {dimension_numbers = #tpu.dot_dimension_numbers<[1], [0], [0], [1], [0, 0, 1, 1], [], []>} : vector<32x192xf32>, vector<192x128xf32>, vector<32x128xf32> -> vector<32x128xf32>
    %36 = vector.extract_strided_slice %1 {offsets = [0, 0], sizes = [1, 128], strides = [1, 1]} : vector<5x128xf32> to vector<1x128xf32>
    %37 = vector.extract_strided_slice %1 {offsets = [1, 0], sizes = [1, 128], strides = [1, 1]} : vector<5x128xf32> to vector<1x128xf32>
    %38 = vector.shape_cast %35 : vector<32x128xf32> to vector<2x16x128xf32>
    %cst_12 = arith.constant dense<0.000000e+00> : vector<2x128xf32>
    %39 = vector.multi_reduction <add>, %38, %cst_12 [1] : vector<2x16x128xf32> to vector<2x128xf32>
    %40 = arith.mulf %38, %38 : vector<2x16x128xf32>
    %cst_13 = arith.constant dense<0.000000e+00> : vector<2x128xf32>
    %41 = vector.multi_reduction <add>, %40, %cst_13 [1] : vector<2x16x128xf32> to vector<2x128xf32>
    %42 = tpu.concatenate %39, %41 in 0 : vector<2x128xf32>, vector<2x128xf32> -> vector<4x128xf32>
    %c8_i32 = arith.constant 8 : i32
    %43 = tpu.dynamic_rotate %42 by %c8_i32 dim 1 : vector<4x128xf32>, i32 -> vector<4x128xf32>
    %44 = arith.addf %42, %43 : vector<4x128xf32>
    %c16_i32_14 = arith.constant 16 : i32
    %45 = tpu.dynamic_rotate %44 by %c16_i32_14 dim 1 : vector<4x128xf32>, i32 -> vector<4x128xf32>
    %46 = arith.addf %44, %45 : vector<4x128xf32>
    %c32_i32 = arith.constant 32 : i32
    %47 = tpu.dynamic_rotate %46 by %c32_i32 dim 1 : vector<4x128xf32>, i32 -> vector<4x128xf32>
    %48 = arith.addf %46, %47 : vector<4x128xf32>
    %c64_i32 = arith.constant 64 : i32
    %49 = tpu.dynamic_rotate %48 by %c64_i32 dim 1 : vector<4x128xf32>, i32 -> vector<4x128xf32>
    %50 = arith.addf %48, %49 : vector<4x128xf32>
    %51 = vector.extract_strided_slice %50 {offsets = [0, 0], sizes = [2, 128], strides = [1, 1]} : vector<4x128xf32> to vector<2x128xf32>
    %cst_15 = arith.constant 3.906250e-03 : f32
    %52 = vector.broadcast %cst_15 : f32 to vector<2x128xf32>
    %53 = arith.mulf %51, %52 : vector<2x128xf32>
    %54 = vector.extract_strided_slice %50 {offsets = [2, 0], sizes = [2, 128], strides = [1, 1]} : vector<4x128xf32> to vector<2x128xf32>
    %cst_16 = arith.constant 3.906250e-03 : f32
    %55 = vector.broadcast %cst_16 : f32 to vector<2x128xf32>
    %56 = arith.mulf %54, %55 : vector<2x128xf32>
    %57 = arith.mulf %53, %53 : vector<2x128xf32>
    %58 = arith.subf %56, %57 : vector<2x128xf32>
    %cst_17 = arith.constant 9.99999974E-6 : f32
    %59 = vector.broadcast %cst_17 : f32 to vector<2x128xf32>
    %60 = arith.addf %58, %59 : vector<2x128xf32>
    %61 = math.rsqrt %60 : vector<2x128xf32>
    %62 = vector.broadcast %36 : vector<1x128xf32> to vector<2x128xf32>
    %63 = arith.mulf %62, %61 : vector<2x128xf32>
    %64 = arith.mulf %53, %63 : vector<2x128xf32>
    %65 = vector.broadcast %37 : vector<1x128xf32> to vector<2x128xf32>
    %66 = arith.subf %65, %64 : vector<2x128xf32>
    %67 = vector.shape_cast %63 : vector<2x128xf32> to vector<2x1x128xf32>
    %68 = vector.broadcast %67 : vector<2x1x128xf32> to vector<2x16x128xf32>
    %69 = arith.mulf %38, %68 : vector<2x16x128xf32>
    %70 = vector.shape_cast %66 : vector<2x128xf32> to vector<2x1x128xf32>
    %71 = vector.broadcast %70 : vector<2x1x128xf32> to vector<2x16x128xf32>
    %72 = arith.addf %69, %71 : vector<2x16x128xf32>
    %73 = vector.shape_cast %72 : vector<2x16x128xf32> to vector<32x128xf32>
    %cst_18 = arith.constant 0.000000e+00 : f32
    %74 = vector.broadcast %cst_18 : f32 to vector<32x128xf32>
    %75 = arith.cmpf ogt, %73, %74 : vector<32x128xf32>
    %cst_19 = arith.constant 0.00999999977 : f32
    %76 = vector.broadcast %cst_19 : f32 to vector<32x128xf32>
    %77 = arith.mulf %76, %73 : vector<32x128xf32>
    %78 = arith.select %75, %73, %77 : vector<32x128xi1>, vector<32x128xf32>
    %c1_i32_20 = arith.constant 1 : i32
    %79 = tpu.dynamic_rotate %78 by %c1_i32_20 dim 0 : vector<32x128xf32>, i32 -> vector<32x128xf32>
    %cst_21 = arith.constant 0.000000e+00 : f32
    %80 = vector.shape_cast %20 : vector<32x1xi1> to vector<32x1xi1>
    %81 = vector.broadcast %80 : vector<32x1xi1> to vector<32x128xi1>
    %82 = vector.broadcast %cst_21 : f32 to vector<32x128xf32>
    %83 = arith.select %81, %79, %82 : vector<32x128xi1>, vector<32x128xf32>
    %c31_i32_22 = arith.constant 31 : i32
    %84 = tpu.dynamic_rotate %78 by %c31_i32_22 dim 0 : vector<32x128xf32>, i32 -> vector<32x128xf32>
    %cst_23 = arith.constant 0.000000e+00 : f32
    %85 = vector.shape_cast %22 : vector<32x1xi1> to vector<32x1xi1>
    %86 = vector.broadcast %85 : vector<32x1xi1> to vector<32x128xi1>
    %87 = vector.broadcast %cst_23 : f32 to vector<32x128xf32>
    %88 = arith.select %86, %84, %87 : vector<32x128xi1>, vector<32x128xf32>
    %89 = tpu.concatenate %83, %78, %88 in 1 : vector<32x128xf32>, vector<32x128xf32>, vector<32x128xf32> -> vector<32x384xf32>
    %c0_24 = arith.constant 0 : index
    %c0_25 = arith.constant 0 : index
    %90 = vector.load %arg3[%c0_24, %c0_25] : memref<384x128xf32, #tpu.memory_space<vmem>>, vector<384x128xf32>
    %cst_26 = arith.constant dense<0.000000e+00> : vector<32x128xf32>
    %91 = tpu.matmul %89, %90, %cst_26 {dimension_numbers = #tpu.dot_dimension_numbers<[1], [0], [0], [1], [0, 0, 1, 1], [], []>} : vector<32x384xf32>, vector<384x128xf32>, vector<32x128xf32> -> vector<32x128xf32>
    %92 = vector.extract_strided_slice %1 {offsets = [2, 0], sizes = [1, 128], strides = [1, 1]} : vector<5x128xf32> to vector<1x128xf32>
    %93 = vector.extract_strided_slice %1 {offsets = [3, 0], sizes = [1, 128], strides = [1, 1]} : vector<5x128xf32> to vector<1x128xf32>
    %94 = vector.shape_cast %91 : vector<32x128xf32> to vector<2x16x128xf32>
    %cst_27 = arith.constant dense<0.000000e+00> : vector<2x128xf32>
    %95 = vector.multi_reduction <add>, %94, %cst_27 [1] : vector<2x16x128xf32> to vector<2x128xf32>
    %96 = arith.mulf %94, %94 : vector<2x16x128xf32>
    %cst_28 = arith.constant dense<0.000000e+00> : vector<2x128xf32>
    %97 = vector.multi_reduction <add>, %96, %cst_28 [1] : vector<2x16x128xf32> to vector<2x128xf32>
    %98 = tpu.concatenate %95, %97 in 0 : vector<2x128xf32>, vector<2x128xf32> -> vector<4x128xf32>
    %c8_i32_29 = arith.constant 8 : i32
    %99 = tpu.dynamic_rotate %98 by %c8_i32_29 dim 1 : vector<4x128xf32>, i32 -> vector<4x128xf32>
    %100 = arith.addf %98, %99 : vector<4x128xf32>
    %c16_i32_30 = arith.constant 16 : i32
    %101 = tpu.dynamic_rotate %100 by %c16_i32_30 dim 1 : vector<4x128xf32>, i32 -> vector<4x128xf32>
    %102 = arith.addf %100, %101 : vector<4x128xf32>
    %c32_i32_31 = arith.constant 32 : i32
    %103 = tpu.dynamic_rotate %102 by %c32_i32_31 dim 1 : vector<4x128xf32>, i32 -> vector<4x128xf32>
    %104 = arith.addf %102, %103 : vector<4x128xf32>
    %c64_i32_32 = arith.constant 64 : i32
    %105 = tpu.dynamic_rotate %104 by %c64_i32_32 dim 1 : vector<4x128xf32>, i32 -> vector<4x128xf32>
    %106 = arith.addf %104, %105 : vector<4x128xf32>
    %107 = vector.extract_strided_slice %106 {offsets = [0, 0], sizes = [2, 128], strides = [1, 1]} : vector<4x128xf32> to vector<2x128xf32>
    %cst_33 = arith.constant 3.906250e-03 : f32
    %108 = vector.broadcast %cst_33 : f32 to vector<2x128xf32>
    %109 = arith.mulf %107, %108 : vector<2x128xf32>
    %110 = vector.extract_strided_slice %106 {offsets = [2, 0], sizes = [2, 128], strides = [1, 1]} : vector<4x128xf32> to vector<2x128xf32>
    %cst_34 = arith.constant 3.906250e-03 : f32
    %111 = vector.broadcast %cst_34 : f32 to vector<2x128xf32>
    %112 = arith.mulf %110, %111 : vector<2x128xf32>
    %113 = arith.mulf %109, %109 : vector<2x128xf32>
    %114 = arith.subf %112, %113 : vector<2x128xf32>
    %cst_35 = arith.constant 9.99999974E-6 : f32
    %115 = vector.broadcast %cst_35 : f32 to vector<2x128xf32>
    %116 = arith.addf %114, %115 : vector<2x128xf32>
    %117 = math.rsqrt %116 : vector<2x128xf32>
    %118 = vector.broadcast %92 : vector<1x128xf32> to vector<2x128xf32>
    %119 = arith.mulf %118, %117 : vector<2x128xf32>
    %120 = arith.mulf %109, %119 : vector<2x128xf32>
    %121 = vector.broadcast %93 : vector<1x128xf32> to vector<2x128xf32>
    %122 = arith.subf %121, %120 : vector<2x128xf32>
    %123 = vector.shape_cast %119 : vector<2x128xf32> to vector<2x1x128xf32>
    %124 = vector.broadcast %123 : vector<2x1x128xf32> to vector<2x16x128xf32>
    %125 = arith.mulf %94, %124 : vector<2x16x128xf32>
    %126 = vector.shape_cast %122 : vector<2x128xf32> to vector<2x1x128xf32>
    %127 = vector.broadcast %126 : vector<2x1x128xf32> to vector<2x16x128xf32>
    %128 = arith.addf %125, %127 : vector<2x16x128xf32>
    %129 = vector.shape_cast %128 : vector<2x16x128xf32> to vector<32x128xf32>
    %c0_36 = arith.constant 0 : index
    %c0_37 = arith.constant 0 : index
    %130 = vector.load %arg4[%c0_36, %c0_37] : memref<64x128xf32, #tpu.memory_space<vmem>>, vector<64x128xf32>
    %cst_38 = arith.constant dense<0.000000e+00> : vector<32x128xf32>
    %131 = tpu.matmul %0, %130, %cst_38 {dimension_numbers = #tpu.dot_dimension_numbers<[1], [0], [0], [1], [0, 0, 1, 1], [], []>} : vector<32x64xf32>, vector<64x128xf32>, vector<32x128xf32> -> vector<32x128xf32>
    %132 = vector.extract_strided_slice %1 {offsets = [4, 0], sizes = [1, 128], strides = [1, 1]} : vector<5x128xf32> to vector<1x128xf32>
    %133 = vector.broadcast %132 : vector<1x128xf32> to vector<32x128xf32>
    %134 = arith.addf %131, %133 : vector<32x128xf32>
    %135 = arith.addf %129, %134 : vector<32x128xf32>
    %cst_39 = arith.constant 0.000000e+00 : f32
    %136 = vector.broadcast %cst_39 : f32 to vector<32x128xf32>
    %137 = arith.cmpf ogt, %135, %136 : vector<32x128xf32>
    %cst_40 = arith.constant 0.00999999977 : f32
    %138 = vector.broadcast %cst_40 : f32 to vector<32x128xf32>
    %139 = arith.mulf %138, %135 : vector<32x128xf32>
    %140 = arith.select %137, %135, %139 : vector<32x128xi1>, vector<32x128xf32>
    %c0_41 = arith.constant 0 : index
    %c0_42 = arith.constant 0 : index
    %141 = vector.load %arg6[%c0_41, %c0_42] : memref<32x128xf32, #tpu.memory_space<vmem>>, vector<32x128xf32>
    tpu.vector_store %arg6[%c0_41, %c0_42], %140 {strides = array<i32>} : memref<32x128xf32, #tpu.memory_space<vmem>>, vector<32x128xf32>,
    return
  }
  func.func @transform_0(%arg0: i32) -> (i32, i32) {
    %c0_i32 = arith.constant 0 : i32
    %c0_i32_0 = arith.constant 0 : i32
    return %arg0, %c0_i32 : i32, i32
  }
  func.func @transform_1(%arg0: i32) -> (i32, i32) {
    %c0_i32 = arith.constant 0 : i32
    %c0_i32_0 = arith.constant 0 : i32
    %c0_i32_1 = arith.constant 0 : i32
    return %c0_i32, %c0_i32_0 : i32, i32
  }
  func.func @transform_2(%arg0: i32) -> (i32, i32) {
    %c0_i32 = arith.constant 0 : i32
    %c0_i32_0 = arith.constant 0 : i32
    %c0_i32_1 = arith.constant 0 : i32
    return %c0_i32, %c0_i32_0 : i32, i32
  }
  func.func @transform_3(%arg0: i32) -> (i32, i32) {
    %c0_i32 = arith.constant 0 : i32
    %c0_i32_0 = arith.constant 0 : i32
    %c0_i32_1 = arith.constant 0 : i32
    return %c0_i32, %c0_i32_0 : i32, i32
  }
  func.func @transform_4(%arg0: i32) -> (i32, i32) {
    %c0_i32 = arith.constant 0 : i32
    %c0_i32_0 = arith.constant 0 : i32
    %c0_i32_1 = arith.constant 0 : i32
    return %c0_i32, %c0_i32_0 : i32, i32
  }
  func.func @transform_5(%arg0: i32) -> (i32, i32) {
    %c0_i32 = arith.constant 0 : i32
    %c0_i32_0 = arith.constant 0 : i32
    return %arg0, %c0_i32 : i32, i32
  }
}

</mosaic_0001>

<bundles_post_ra>
// kernel: tpu_custom_call.1
= control target key start
LH: loop header
LB: loop body
LE: loop exit
PB: predicated region body
PF: predicated region fallthrough
CT: control target
= control target key end

     0   :  { %10 = vsyncpa [#allocation3], 0  ;;  %s1679_s0 = inlined_call_operand.hbm [shape: f32[32,64], index: 0, kind: input, shape index: {}]   ;;  %s1680_s1 = inlined_call_operand.hbm [shape: f32[192,128], index: 1, kind: input, shape index: {}]   ;;  %s1681_s2 = inlined_call_operand.hbm [shape: f32[384,128], index: 2, kind: input, shape index: {}]   ;;  %s1682_s3 = inlined_call_operand.hbm [shape: f32[64,128], index: 3, kind: input, shape index: {}]   ;;  %s1683_s4 = inlined_call_operand.hbm [shape: f32[5,128], index: 4, kind: input, shape index: {}]   ;;  %s1684_s5 = inlined_call_operand.hbm [shape: f32[32,128], index: 5, kind: output, shape index: {}]  }
   0x1   :  { %11 = vsyncpa [#allocation6], 0 }
   0x2   :  { %12 = vsyncpa [#allocation9], 0 }
   0x3   :  { %13 = vsyncpa [#allocation4], 0  ;;  %s1331_s18 = smov [#allocation5]   ;;  %s1332_s20 = smov [#allocation8]  }
   0x4   :  { %s31_s19 = sshll.u32 %s1331_s18, 4  ;;  %s55_s21 = sshll.u32 %s1332_s20, 4  ;;  %s32_s19 = int_to_ptr.vmem [resolvable:$true] %s31_s19  ;;  %s56_s21 = int_to_ptr.vmem [resolvable:$true] %s55_s21 }
   0x5   :  { %s1211_s22 = scalar_lea.vmem %s32_s19, 3072  ;;  %p1216_p1 = scmp.lt.s32.totalorder %s32_s19, %s32_s19 }
   0x6   :  { %p1212_p0 = scmp.ne.s32.totalorder %s32_s19, %s1211_s22  ;;  %p1217_p2 = scmp.lt.s32.totalorder %s1211_s22, %s1211_s22 }
   0x8   :  { %p1218_p3 = por %p1217_p2, %p1216_p1 }
   0xa   :  { %p1219_p4 = pnand %p1218_p3, %p1212_p0 }
   0xc   :  { %1222 = shalt.err (!%p1219_p4)
}
   0xd   :  { %s1333_s23 = smov 128   ;;  %s1334_s24 = smov 8  }
   0xe   :  { %37 = dma.hbm_to_vmem [thread:$0]  %s1680_s1, 3072, %s32_s19, [#allocation6], %s1333_s23, %s1333_s23, %s1334_s24  }
   0xf   :  { %s1231_s27 = scalar_lea.vmem %s56_s21, 1024  ;;  %p1236_p6 = scmp.lt.s32.totalorder %s56_s21, %s56_s21 }
  0x10   :  { %p1232_p5 = scmp.ne.s32.totalorder %s56_s21, %s1231_s27  ;;  %p1237_p7 = scmp.lt.s32.totalorder %s1231_s27, %s1231_s27 }
  0x12   :  { %p1238_p8 = por %p1237_p7, %p1236_p6 }
  0x14   :  { %p1239_p9 = pnand %p1238_p8, %p1232_p5 }
  0x16   :  { %1242 = shalt.err (!%p1239_p9)
}
  0x17   :  { %61 = dma.hbm_to_vmem [thread:$0]  %s1682_s3, 1024, %s56_s21, [#allocation9], %s1333_s23, %s1333_s23, %s1334_s24  }
  0x18   :  { %s1335_s30 = smov [#allocation2]   ;;  %s1336_s7 = smov [#allocation7]  }
  0x19   :  { %s19_s6 = sshll.u32 %s1335_s30, 4  ;;  %s43_s8 = sshll.u32 %s1336_s7, 4  ;;  %s20_s6 = int_to_ptr.vmem [resolvable:$true] %s19_s6  ;;  %s44_s8 = int_to_ptr.vmem [resolvable:$true] %s43_s8 }
  0x1a   :  { %s1251_s1 = scalar_lea.vmem %s20_s6, 512  ;;  %p1256_p11 = scmp.lt.s32.totalorder %s20_s6, %s20_s6 }
  0x1b   :  { %p1252_p10 = scmp.ne.s32.totalorder %s20_s6, %s1251_s1  ;;  %p1257_p12 = scmp.lt.s32.totalorder %s1251_s1, %s1251_s1 }
  0x1d   :  { %p1258_p13 = por %p1257_p12, %p1256_p11 }
  0x1f   :  { %p1259_p0 = pnand %p1258_p13, %p1252_p10 }
  0x21   :  { %1262 = shalt.err (!%p1259_p0)
}
  0x22   :  { %25 = dma.hbm_to_vmem [thread:$0]  %s1679_s0, 512, %s20_s6, [#allocation3], %s1333_s23, %s1333_s23, %s1334_s24  }
  0x23   :  { %s1271_s3 = scalar_lea.vmem %s44_s8, 6144  ;;  %p1276_p2 = scmp.lt.s32.totalorder %s44_s8, %s44_s8 }
  0x24   :  { %p1272_p1 = scmp.ne.s32.totalorder %s44_s8, %s1271_s3  ;;  %p1277_p3 = scmp.lt.s32.totalorder %s1271_s3, %s1271_s3 }
  0x26   :  { %p1278_p4 = por %p1277_p3, %p1276_p2 }
  0x28   :  { %p1279_p5 = pnand %p1278_p4, %p1272_p1 }
  0x2a   :  { %1282 = shalt.err (!%p1279_p5)
}
  0x2b   :  { %49 = dma.hbm_to_vmem [thread:$0]  %s1681_s2, 6144, %s44_s8, [#allocation6], %s1333_s23, %s1333_s23, %s1334_s24  }
  0x2c   :  { %s1337_s13 = smov [#allocation10]  }
  0x2d   :  { %s68_s14 = sshll.u32 %s1337_s13, 4  ;;  %s69_s14 = int_to_ptr.vmem [resolvable:$true] %s68_s14 }
  0x2e   :  { %s1291_s15 = scalar_lea.vmem %s69_s14, 128  ;;  %p1296_p7 = scmp.lt.s32.totalorder %s69_s14, %s69_s14 }
  0x2f   :  { %p1292_p6 = scmp.ne.s32.totalorder %s69_s14, %s1291_s15  ;;  %p1297_p8 = scmp.lt.s32.totalorder %s1291_s15, %s1291_s15 }
  0x31   :  { %p1298_p9 = por %p1297_p8, %p1296_p7 }
  0x33   :  { %p1299_p10 = pnand %p1298_p9, %p1292_p6 }
  0x35   :  { %1302 = shalt.err (!%p1299_p10)
}
  0x36   :  { %71 = dma.hbm_to_vmem [thread:$0]  %s1683_s4, 128, %s69_s14, [#allocation9]  }
  0x37   :  { %1323 = dma.done.wait [#allocation3], 512  }
  0x38   :  { %1324 = vsyncadd [#allocation3], 4294966784 }
  0x39   :  { %1325 = dma.done.wait [#allocation6], 9216  }
  0x3a   :  { %1326 = vsyncadd [#allocation6], 4294958080 }
  0x3b   :  { %1327 = dma.done.wait [#allocation9], 1152  }
  0x3c   :  { %1328 = vsyncadd [#allocation9], 4294966144  ;;  %v1338_v0 = vmov 0.0   ;;  %v92_v1 = vlaneseq  ;;  %v1402_v2 = vld [vmem:[#allocation2] sm:$0xff]  ;;  %v1404_v3 = vld [vmem:[#allocation2 + $0x10] sm:$0xff]  ;;  %s1339_s2 = smov 64  }
  0x3d   :  { %252 = vmatprep.subr.mxu0 %v1338_v0  ;;  %199 = vrot.lane.b32.xlu0 %v1402_v2, %s1339_s2  ;;  %v231_v5 = vld [vmem:[#allocation5 + $0x78] sm:$0xff]  ;;  %v1412_v6 = vld [vmem:[#allocation2 + $0x8] sm:$0xff]  ;;  %v230_v8 = vld [vmem:[#allocation5 + $0x70] sm:$0xff]  ;;  %v174_v9 = vrot.slane %v1402_v2, 1  ;;  %vm211_vm1 = vcmask 523264   ;;  %v153_v35 = vrot.slane %v1402_v2, 7 }
  0x3e   :  { %v1406_v4 = vshrl.u32 %v92_v1, 7  ;;  %203 = vrot.lane.b32.xlu1 %v1404_v3, %s1339_s2  ;;  %v1414_v7 = vld [vmem:[#allocation2 + $0x18] sm:$0xff]  ;;  %253 = vmatpush1.msra.mxu0 %v231_v5  ;;  %v175_v10 = vrot.slane %v1412_v6, 1  ;;  %v229_v11 = vld [vmem:[#allocation5 + $0x68] sm:$0xff]  ;;  %v228_v13 = vld [vmem:[#allocation5 + $0x60] sm:$0xff]  ;;  %v176_v38 = vrot.slane %v1404_v3, 1 }
  0x3f   :  { %254 = vmatprep.subr.mxu0 %v1338_v0  ;;  %v227_v14 = vld [vmem:[#allocation5 + $0x58] sm:$0xff]  ;;  %v226_v15 = vld [vmem:[#allocation5 + $0x50] sm:$0xff]  ;;  %v225_v16 = vld [vmem:[#allocation5 + $0x48] sm:$0xff]  ;;  %v156_v36 = vrot.slane %v1414_v7, 7  ;;  %v155_v44 = vrot.slane %v1404_v3, 7  ;;  %v154_v48 = vrot.slane %v1412_v6, 7 }
  0x40   :  { %vm178_vm0 = vcmp.lt.s32.totalorder %v1406_v4, 7  ;;  %255 = vmatpush1.msra.mxu0 %v230_v8  ;;  %v224_v17 = vld [vmem:[#allocation5 + $0x40] sm:$0xff]  ;;  %v223_v18 = vld [vmem:[#allocation5 + $0x38] sm:$0xff]  ;;  %v222_v19 = vld [vmem:[#allocation5 + $0x30] sm:$0xff]  ;;  %v94_v34 = vadd.s32 8, %v1406_v4  ;;  %v101_v37 = vand.u32 15, %v1406_v4 }
  0x41   :  { %201 = vrot.lane.b32.xlu0 %v1412_v6, %s1339_s2  ;;  %v181_v12 = vsel %vm178_vm0, %v174_v9, %v175_v10  ;;  %256 = vmatprep.subr.mxu0 %v1338_v0  ;;  %v221_v20 = vld [vmem:[#allocation5 + $0x28] sm:$0xff]  ;;  %v220_v21 = vld [vmem:[#allocation5 + $0x20] sm:$0xff]  ;;  %v219_v22 = vld [vmem:[#allocation5 + $0x18] sm:$0xff]  ;;  %vm157_vm2 = vcmp.lt.s32.totalorder %v1406_v4, 1  ;;  %v95_v40 = vadd.s32 16, %v1406_v4  ;;  %v96_v43 = vadd.s32 24, %v1406_v4 }
  0x42   :  { %205 = vrot.lane.b32.xlu1 %v1414_v7, %s1339_s2  ;;  %1038 = vmatprep.mubr.msk.f32.mxu0 %vm211_vm1, %v181_v12  ;;  %v218_v23 = vld [vmem:[#allocation5 + $0x10] sm:$0xff]  ;;  %v217_v24 = vld [vmem:[#allocation5 + $0x8] sm:$0xff]  ;;  %v216_v25 = vld [vmem:[#allocation5] sm:$0xff]  ;;  %v108_v39 = vand.u32 15, %v94_v34  ;;  %vm1460_vm3 = vcmp.ge.s32.totalorder %v101_v37, 1  ;;  %v161_v42 = vsel %vm157_vm2, %v156_v36, %v153_v35  ;;  %v180_v46 = vsel %vm178_vm0, %v175_v10, %v176_v38  ;;  %s1340_s4 = smov 16  }
  0x43   :  { %257 = vmatpush1.msra.mxu0 %v229_v11  ;;  %v239_v26 = vld [vmem:[#allocation5 + $0xb8] sm:$0xff]  ;;  %v238_v27 = vld [vmem:[#allocation5 + $0xb0] sm:$0xff]  ;;  %v237_v28 = vld [vmem:[#allocation5 + $0xa8] sm:$0xff]  ;;  %v115_v47 = vand.u32 15, %v95_v40  ;;  %v170_v49 = vsel %vm1460_vm3, %v161_v42, 0.0  ;;  %v177_v50 = vrot.slane %v1414_v7, 1  ;;  %v159_v55 = vsel %vm157_vm2, %v154_v48, %v155_v44 }
  0x44   :  { %258 = vmatprep.subr.mxu0 %v1338_v0  ;;  %v236_v29 = vld [vmem:[#allocation5 + $0xa0] sm:$0xff]  ;;  %v235_v30 = vld [vmem:[#allocation5 + $0x98] sm:$0xff]  ;;  %v234_v31 = vld [vmem:[#allocation5 + $0x90] sm:$0xff]  ;;  %vm1468_vm4 = vcmp.le.s32.totalorder %v108_v39, 14  ;;  %v122_v56 = vand.u32 15, %v96_v43  ;;  %v160_v57 = vsel %vm157_vm2, %v153_v35, %v154_v48  ;;  %v158_v10 = vsel %vm157_vm2, %v155_v44, %v156_v36  ;;  %s1341_s17 = smov 32  }
  0x45   :  { %259 = vmatpush1.msra.mxu0 %v228_v13  ;;  %v233_v32 = vld [vmem:[#allocation5 + $0x88] sm:$0xff]  ;;  %v232_v33 = vld [vmem:[#allocation5 + $0x80] sm:$0xff]  ;;  %v192_v52 = vsel %vm1468_vm4, %v180_v46, 0.0  ;;  %vm1483_vm5 = vcmp.ge.s32.totalorder %v115_v47, 1  ;;  %v179_v60 = vsel %vm178_vm0, %v176_v38, %v177_v50  ;;  %vm371_vm7 = vcmask 1041409   ;;  %v569_v41 = vld [vmem:[#allocation7 + $0x158] sm:$0xff] }
  0x46   :  { %260 = vmatprep.subr.mxu0 %v1338_v0  ;;  %v172_v61 = vsel %vm1483_vm5, %v159_v55, 0.0  ;;  %vm1497_vm6 = vcmp.le.s32.totalorder %v122_v56, 14  ;;  %vm376_vm8 = vcmask 1043459   ;;  %vm379_vm9 = vcmask 1041408   ;;  %v564_v54 = vld [vmem:[#allocation7 + $0x130] sm:$0xff]  ;;  %s1343_s18 = smov [#allocation11]  }
  0x47   :  { %261 = vmatpush1.msra.mxu0 %v227_v14  ;;  %s1024_s19 = sshll.u32 %s1343_s18, 4  ;;  %s1025_s19 = int_to_ptr.vmem [resolvable:$true] %s1024_s19 }
  0x48   :  { %262 = vmatprep.subr.mxu0 %v1338_v0  ;;  %s1303_s20 = scalar_lea.vmem %s1025_s19, 512  ;;  %p1308_p12 = scmp.lt.s32.totalorder %s1025_s19, %s1025_s19 }
  0x49   :  { %263 = vmatpush1.msra.mxu0 %v226_v15  ;;  %p1304_p11 = scmp.ne.s32.totalorder %s1025_s19, %s1303_s20  ;;  %p1309_p13 = scmp.lt.s32.totalorder %s1303_s20, %s1303_s20 }
  0x4a   :  { %264 = vmatprep.subr.mxu0 %v1338_v0 }
  0x4b   :  { %265 = vmatpush1.msra.mxu0 %v225_v16  ;;  %p1310_p0 = por %p1309_p13, %p1308_p12 }
  0x4c   :  { %266 = vmatprep.subr.mxu0 %v1338_v0 }
  0x4d   :  { %267 = vmatpush1.msra.mxu0 %v224_v17  ;;  %p1311_p1 = pnand %p1310_p0, %p1304_p11 }
  0x4e   :  { %268 = vmatprep.subr.mxu0 %v1338_v0 }
  0x4f   :  { %269 = vmatpush1.msra.mxu0 %v223_v18 }
  0x50   :  { %270 = vmatprep.subr.mxu0 %v1338_v0 }
  0x51   :  { %271 = vmatpush1.msra.mxu0 %v222_v19 }
  0x52   :  { %272 = vmatprep.subr.mxu0 %v1338_v0 }
  0x53   :  { %273 = vmatpush1.msra.mxu0 %v221_v20 }
  0x54   :  { %274 = vmatprep.subr.mxu0 %v1338_v0 }
  0x55   :  { %275 = vmatpush1.msra.mxu0 %v220_v21 }
  0x56   :  { %276 = vmatprep.subr.mxu0 %v1338_v0 }
  0x57   :  { %277 = vmatpush1.msra.mxu0 %v219_v22 }
  0x58   :  { %278 = vmatprep.subr.mxu0 %v1338_v0 }
  0x59   :  { %279 = vmatpush1.msra.mxu0 %v218_v23 }
  0x5a   :  { %280 = vmatprep.subr.mxu0 %v1338_v0 }
  0x5b   :  { %281 = vmatpush1.msra.mxu0 %v217_v24 }
  0x5c   :  { %282 = vmatprep.subr.mxu0 %v1338_v0 }
  0x5d   :  { %283 = vmatpush1.msra.mxu0 %v216_v25 }
  0x5e   :  { %300 = vmatprep.subr.mxu0 %v1338_v0 }
  0x5f   :  { %301 = vmatpush2.msra.mxu0 %v239_v26 }
  0x60   :  { %302 = vmatprep.subr.mxu0 %v1338_v0 }
  0x61   :  { %303 = vmatpush2.msra.mxu0 %v238_v27 }
  0x62   :  { %304 = vmatprep.subr.mxu0 %v1338_v0 }
  0x63   :  { %305 = vmatpush2.msra.mxu0 %v237_v28 }
  0x64   :  { %306 = vmatprep.subr.mxu0 %v1338_v0 }
  0x65   :  { %307 = vmatpush2.msra.mxu0 %v236_v29 }
  0x66   :  { %308 = vmatprep.subr.mxu0 %v1338_v0 }
  0x67   :  { %309 = vmatpush2.msra.mxu0 %v235_v30 }
  0x68   :  { %310 = vmatprep.subr.mxu0 %v1338_v0 }
  0x69   :  { %311 = vmatpush2.msra.mxu0 %v234_v31 }
  0x6a   :  { %312 = vmatprep.subr.mxu0 %v1338_v0 }
  0x6b   :  { %313 = vmatpush2.msra.mxu0 %v233_v32 }
  0x6c   :  { %314 = vmatprep.subr.mxu0 %v1338_v0  ;;  %v182_v0 = vsel %vm178_vm0, %v177_v50, %v174_v9 }
  0x6d   :  { %315 = vmatpush2.msra.mxu0 %v232_v33  ;;  %v194_v8 = vsel %vm1497_vm6, %v182_v0, 0.0  ;;  %v541_v0 = vld [vmem:[#allocation7 + $0x78] sm:$0xff] }
  0xaf   :  { %v200_v51 = vpop.permute.xlu0 %199 }
  0xb0   :  { %v212_v53 = vsel %vm211_vm1, %v170_v49, %v200_v51  ;;  %v204_v58 = vpop.permute.xlu1 %203 }
  0xb1   :  { %317 = vmatmul.mubr.f32.vlgmr.msra.gmra.mxu0 %v212_v53  ;;  %v214_v1 = vsel %vm211_vm1, %v172_v61, %v204_v58 }
  0xb2   :  { %1039 = vmatprep.mubr.msk.f32.mxu0 %vm211_vm1, %v192_v52 }
  0xb3   :  { %v202_v59 = vpop.permute.xlu0 %201 }
  0xb4   :  { %v213_v62 = vsel %vm211_vm1, %v160_v57, %v202_v59  ;;  %v206_v5 = vpop.permute.xlu1 %205 }
  0xb5   :  { %322 = vmatmul.mubr.f32.gmra.mxu0 %v213_v62  ;;  %v215_v11 = vsel %vm211_vm1, %v158_v10, %v206_v5  ;;  %v557_v62 = vld [vmem:[#allocation7 + $0xf8] sm:$0xff]  ;;  %v540_v5 = vld [vmem:[#allocation7 + $0x70] sm:$0xff]  ;;  %v539_v10 = vld [vmem:[#allocation7 + $0x68] sm:$0xff] }
  0xb6   :  { %1040 = vmatprep.mubr.msk.f32.mxu0 %vm211_vm1, %v179_v60  ;;  %1050 = vmatprep.subr.mxu1 %v557_v62 }
  0xb7   :  { %1051 = vmatpush3.msra.mxu1 %v541_v0 }
  0xb9   :  { %327 = vmatmul.mubr.f32.gmra.mxu0 %v214_v1  ;;  %v556_v1 = vld [vmem:[#allocation7 + $0xf0] sm:$0xff] }
  0xba   :  { %1041 = vmatprep.mubr.msk.f32.mxu0 %vm211_vm1, %v194_v8  ;;  %1052 = vmatprep.subr.mxu1 %v556_v1  ;;  %v555_v8 = vld [vmem:[#allocation7 + $0xe8] sm:$0xff] }
  0xbb   :  { %1053 = vmatpush3.msra.mxu1 %v540_v5 }
  0xbc   :  { %1054 = vmatprep.subr.mxu1 %v555_v8 }
  0xbd   :  { %332 = vmatmul.mubr.f32.gmra.mxu0 %v215_v11  ;;  %1055 = vmatpush3.msra.mxu1 %v539_v10  ;;  %v554_v11 = vld [vmem:[#allocation7 + $0xe0] sm:$0xff] }
  0xbe   :  { %1180 = vmatprep.mubr.msk.f32.mxu0 %vm211_vm1, %v1402_v2  ;;  %1056 = vmatprep.subr.mxu1 %v554_v11 }
 0x171   :  { %v1515_v9 = vpop.f32.mrf.mxu0 }
 0x172   :  { %v351_v14 = vmul.f32 %v1515_v9, %v1515_v9 }
 0x173   :  { %v320_v12 = vpop.f32.mrf.mxu0 }
 0x174   :  { %v538_v12 = vld [vmem:[#allocation7 + $0x60] sm:$0xff] }
 0x175   :  { %v1517_v13 = vpop.f32.mrf.mxu0  ;;  %1057 = vmatpush3.msra.mxu1 %v538_v12 }
 0x176   :  { %v337_v15 = vadd.f32 %v1517_v13, %v1515_v9  ;;  %v352_v16 = vmul.f32 %v1517_v13, %v1517_v13 }
 0x177   :  { %v325_v17 = vpop.f32.mrf.mxu0 }
 0x178   :  { %v338_v18 = vrot.slane %v337_v15, 4  ;;  %v355_v19 = vadd.f32 %v352_v16, %v351_v14  ;;  %v553_v14 = vld [vmem:[#allocation7 + $0xd8] sm:$0xff]  ;;  %v552_v16 = vld [vmem:[#allocation7 + $0xd0] sm:$0xff] }
 0x179   :  { %v1525_v20 = vpop.f32.mrf.mxu0  ;;  %1058 = vmatprep.subr.mxu1 %v553_v14  ;;  %v536_v17 = vld [vmem:[#allocation7 + $0x50] sm:$0xff] }
 0x17a   :  { %v356_v2 = vrot.slane %v355_v19, 4  ;;  %v339_v22 = vadd.f32 %v338_v18, %v337_v15  ;;  %v353_v25 = vmul.f32 %v1525_v20, %v1525_v20  ;;  %v537_v15 = vld [vmem:[#allocation7 + $0x58] sm:$0xff]  ;;  %v551_v18 = vld [vmem:[#allocation7 + $0xc8] sm:$0xff] }
 0x17b   :  { %v330_v21 = vpop.f32.mrf.mxu0  ;;  %1059 = vmatpush3.msra.mxu1 %v537_v15 }
 0x17c   :  { %v357_v23 = vadd.f32 %v356_v2, %v355_v19  ;;  %v340_v29 = vrot.slane %v339_v22, 2  ;;  %1060 = vmatprep.subr.mxu1 %v552_v16  ;;  %v535_v19 = vld [vmem:[#allocation7 + $0x48] sm:$0xff]  ;;  %v550_v2 = vld [vmem:[#allocation7 + $0xc0] sm:$0xff] }
 0x17d   :  { %v1527_v24 = vpop.f32.mrf.mxu0  ;;  %1061 = vmatpush3.msra.mxu1 %v536_v17  ;;  %v534_v21 = vld [vmem:[#allocation7 + $0x40] sm:$0xff] }
 0x17e   :  { %v344_v26 = vadd.f32 %v1527_v24, %v1525_v20  ;;  %v354_v27 = vmul.f32 %v1527_v24, %v1527_v24  ;;  %v358_v30 = vrot.slane %v357_v23, 2  ;;  %v341_v35 = vadd.f32 %v340_v29, %v339_v22  ;;  %1062 = vmatprep.subr.mxu1 %v551_v18  ;;  %v549_v22 = vld [vmem:[#allocation7 + $0xb8] sm:$0xff]  ;;  %v546_v29 = vld [vmem:[#allocation7 + $0xa0] sm:$0xff] }
 0x17f   :  { %v335_v28 = vpop.f32.mrf.mxu0  ;;  %1063 = vmatpush3.msra.mxu1 %v535_v19 }
 0x180   :  { %v345_v31 = vrot.slane %v344_v26, 4  ;;  %v362_v32 = vadd.f32 %v354_v27, %v353_v25  ;;  %v359_v38 = vadd.f32 %v358_v30, %v357_v23  ;;  %v342_v42 = vrot.slane %v341_v35, 1  ;;  %1064 = vmatprep.subr.mxu1 %v550_v2  ;;  %v533_v23 = vld [vmem:[#allocation7 + $0x38] sm:$0xff]  ;;  %v548_v25 = vld [vmem:[#allocation7 + $0xb0] sm:$0xff]  ;;  %v547_v27 = vld [vmem:[#allocation7 + $0xa8] sm:$0xff] }
 0x181   :  { %1065 = vmatpush3.msra.mxu1 %v534_v21  ;;  %v531_v28 = vld [vmem:[#allocation7 + $0x28] sm:$0xff]  ;;  %v530_v30 = vld [vmem:[#allocation7 + $0x20] sm:$0xff] }
 0x182   :  { %v346_v33 = vadd.f32 %v345_v31, %v344_v26  ;;  %v363_v34 = vrot.slane %v362_v32, 4  ;;  %v360_v44 = vrot.slane %v359_v38, 1  ;;  %v343_v49 = vadd.f32 %v342_v42, %v341_v35  ;;  %1066 = vmatprep.subr.mxu1 %v549_v22  ;;  %v532_v26 = vld [vmem:[#allocation7 + $0x30] sm:$0xff]  ;;  %v545_v31 = vld [vmem:[#allocation7 + $0x98] sm:$0xff]  ;;  %v543_v35 = vld [vmem:[#allocation7 + $0x88] sm:$0xff] }
 0x183   :  { %1067 = vmatpush3.msra.mxu1 %v533_v23 }
 0x184   :  { %v347_v36 = vrot.slane %v346_v33, 2  ;;  %v364_v37 = vadd.f32 %v363_v34, %v362_v32  ;;  %v361_v50 = vadd.f32 %v360_v44, %v359_v38  ;;  %1068 = vmatprep.subr.mxu1 %v548_v25  ;;  %v529_v32 = vld [vmem:[#allocation7 + $0x18] sm:$0xff]  ;;  %v528_v34 = vld [vmem:[#allocation7 + $0x10] sm:$0xff]  ;;  %v526_v38 = vld [vmem:[#allocation7] sm:$0xff] }
 0x185   :  { %1069 = vmatpush3.msra.mxu1 %v532_v26 }
 0x186   :  { %v348_v39 = vadd.f32 %v347_v36, %v346_v33  ;;  %v365_v40 = vrot.slane %v364_v37, 2  ;;  %1070 = vmatprep.subr.mxu1 %v547_v27  ;;  %v544_v33 = vld [vmem:[#allocation7 + $0x90] sm:$0xff]  ;;  %v527_v36 = vld [vmem:[#allocation7 + $0x8] sm:$0xff] }
 0x187   :  { %1071 = vmatpush3.msra.mxu1 %v531_v28 }
 0x188   :  { %v349_v43 = vrot.slane %v348_v39, 1  ;;  %v366_v46 = vadd.f32 %v365_v40, %v364_v37  ;;  %1072 = vmatprep.subr.mxu1 %v546_v29  ;;  %v542_v37 = vld [vmem:[#allocation7 + $0x80] sm:$0xff] }
 0x189   :  { %1073 = vmatpush3.msra.mxu1 %v530_v30 }
 0x18a   :  { %v350_v47 = vadd.f32 %v349_v43, %v348_v39  ;;  %v367_v48 = vrot.slane %v366_v46, 1  ;;  %1074 = vmatprep.subr.mxu1 %v545_v31  ;;  %v1545_v39 = vld [vmem:[#allocation7 + $0x178] sm:$0xff] }
 0x18b   :  { %1075 = vmatpush3.msra.mxu1 %v529_v32 }
 0x18c   :  { %v368_v51 = vadd.f32 %v367_v48, %v366_v46  ;;  %v372_v52 = vsel %vm371_vm7, %v350_v47, %v343_v49  ;;  %1076 = vmatprep.subr.mxu1 %v544_v33  ;;  %v1342_v49 = vmov 1966171168  }
 0x18d   :  { %1077 = vmatpush3.msra.mxu1 %v528_v34 }
 0x18e   :  { %v377_v53 = vsel %vm376_vm8, %v368_v51, %v361_v50  ;;  %1078 = vmatprep.subr.mxu1 %v543_v35  ;;  %v416_v50 = vunpack.c.l.s4 %v1342_v49  ;;  %v1550_v51 = vsub.s32 0, %v1406_v4 }
 0x18f   :  { %v380_v55 = vsel %vm379_vm9, %v372_v52, %v377_v53  ;;  %1079 = vmatpush3.msra.mxu1 %v527_v36  ;;  %v1552_v52 = vld [vmem:[#allocation10] sm:$0x1f] }
 0x190   :  { %381 = vrot.lane.b32.xlu0 %v380_v55, %s1334_s24  ;;  %1080 = vmatprep.subr.mxu1 %v542_v37  ;;  %v417_v53 = vunpack.c.0.s8 %v416_v50  ;;  %v567_v50 = vld [vmem:[#allocation7 + $0x148] sm:$0xff] }
 0x191   :  { %1081 = vmatpush3.msra.mxu1 %v526_v38  ;;  %v572_v38 = vld [vmem:[#allocation7 + $0x170] sm:$0xff] }
 0x192   :  { %1126 = vmatprep.subr.mxu1 %v1545_v39 }
 0x202   :  { %v382_v56 = vpop.permute.xlu0 %381 }
 0x203   :  { %v383_v57 = vadd.f32 %v382_v56, %v380_v55  ;;  %v404_v55 = vrot.slane %v1552_v52, %v1550_v51  ;;  %v412_v56 = vsub.s32 1, %v1406_v4 }
 0x205   :  { %384 = vrot.lane.b32.xlu1 %v383_v57, %s1340_s4 }
 0x277   :  { %v385_v58 = vpop.permute.xlu1 %384 }
 0x278   :  { %v386_v59 = vadd.f32 %v385_v58, %v383_v57  ;;  %v1558_v57 = vsub.s32 %v417_v53, %v1406_v4 }
 0x27a   :  { %387 = vrot.lane.b32.xlu0 %v386_v59, %s1341_s17 }
 0x2ec   :  { %v388_v60 = vpop.permute.xlu0 %387 }
 0x2ed   :  { %v1541_v61 = vadd.f32 %v388_v60, %v386_v59  ;;  %v413_v60 = vrot.slane %v1552_v52, %v412_v56 }
 0x2ef   :  { %390 = vrot.lane.b32.xlu1 %v1541_v61, %s1339_s2 }
 0x361   :  { %v391_v40 = vpop.permute.xlu1 %390 }
 0x362   :  { %v392_v42 = vadd.f32 %v391_v40, %v1541_v61 }
 0x364   :  { %v393_v43 = vmul.f32 0.00390625, %v392_v42  ;;  %v571_v42 = vld [vmem:[#allocation7 + $0x168] sm:$0xff] }
 0x366   :  { %v394_v44 = vmul.f32 %v393_v43, %v393_v43 }
 0x368   :  { %v396_v46 = vrot.slane %v394_v44, 6 }
 0x36a   :  { %v398_v47 = vsub.f32 %v393_v43, %v396_v46  ;;  %v570_v46 = vld [vmem:[#allocation7 + $0x160] sm:$0xff] }
 0x36c   :  { %v399_v48 = vadd.f32 1e-05, %v398_v47  ;;  %v568_v47 = vld [vmem:[#allocation7 + $0x150] sm:$0xff] }
 0x36e   :  { %1199 = vrsqrt.f32 %v399_v48 }
 0x37b   :  { %v1200_v58 = vpop.eup %1199 }
 0x37c   :  { %v405_v59 = vmul.f32 %v1200_v58, %v404_v55  ;;  %v566_v55 = vld [vmem:[#allocation7 + $0x140] sm:$0xff]  ;;  %v565_v58 = vld [vmem:[#allocation7 + $0x138] sm:$0xff] }
 0x37e   :  { %v407_v61 = vrot.slane %v405_v59, 2  ;;  %v421_v62 = vrot.slane %v405_v59, %v1558_v57  ;;  %v563_v59 = vld [vmem:[#allocation7 + $0x128] sm:$0xff] }
 0x380   :  { %v409_v0 = vmul.f32 %v407_v61, %v393_v43  ;;  %v422_v1 = vcombine.high %v421_v62, %v421_v62  ;;  %v429_v5 = vrot.slane %v421_v62, %v1558_v57  ;;  %v561_v61 = vld [vmem:[#allocation7 + $0x118] sm:$0xff]  ;;  %v560_v62 = vld [vmem:[#allocation7 + $0x110] sm:$0xff] }
 0x382   :  { %v414_v8 = vsub.f32 %v413_v60, %v409_v0  ;;  %v436_v10 = vrot.slane %v422_v1, %v1558_v57  ;;  %v437_v11 = vcombine.high %v429_v5, %v429_v5  ;;  %v562_v60 = vld [vmem:[#allocation7 + $0x120] sm:$0xff]  ;;  %v559_v0 = vld [vmem:[#allocation7 + $0x108] sm:$0xff] }
 0x383   :  { %v558_v5 = vld [vmem:[#allocation7 + $0x100] sm:$0xff] }
 0x384   :  { %v438_v12 = vcombine.high %v436_v10, %v436_v10  ;;  %v460_v14 = vrot.slane %v414_v8, %v1558_v57  ;;  %v442_v15 = vrot.slane %v437_v11, %v1550_v51 }
 0x386   :  { %v446_v16 = vrot.slane %v438_v12, %v1550_v51  ;;  %v461_v17 = vcombine.high %v460_v14, %v460_v14  ;;  %v468_v18 = vrot.slane %v460_v14, %v1558_v57  ;;  %v449_v2 = vmul.f32 %v442_v15, %v1515_v9 }
 0x387   :  { %v450_v22 = vmul.f32 %v442_v15, %v1517_v13 }
 0x388   :  { %v475_v19 = vrot.slane %v461_v17, %v1558_v57  ;;  %v479_v21 = vrot.slane %v468_v18, %v1550_v51  ;;  %v452_v26 = vmul.f32 %v446_v16, %v1527_v24  ;;  %v451_v28 = vmul.f32 %v446_v16, %v1525_v20 }
 0x38a   :  { %v483_v23 = vrot.slane %v475_v19, %v1550_v51  ;;  %v486_v25 = vadd.f32 %v479_v21, %v449_v2  ;;  %v487_v27 = vadd.f32 %v479_v21, %v450_v22 }
 0x38c   :  { %vm490_vm10 = vcmp.gt.f32.partialorder %v486_v25, 0.0  ;;  %v494_v29 = vmul.f32 0.01, %v486_v25  ;;  %v489_v30 = vadd.f32 %v483_v23, %v452_v26  ;;  %vm491_vm11 = vcmp.gt.f32.partialorder %v487_v27, 0.0 }
 0x38d   :  { %v495_v31 = vmul.f32 0.01, %v487_v27  ;;  %v488_v32 = vadd.f32 %v483_v23, %v451_v28 }
 0x38e   :  { %v1575_v33 = vsel %vm490_vm10, %v486_v25, %v494_v29  ;;  %vm493_vm12 = vcmp.gt.f32.partialorder %v489_v30, 0.0  ;;  %v497_v9 = vmul.f32 0.01, %v489_v30 }
 0x38f   :  { %638 = vmatprep.mubr.f32.mxu1 %v1575_v33  ;;  %v1580_v34 = vsel %vm491_vm11, %v487_v27, %v495_v31  ;;  %v496_v24 = vmul.f32 0.01, %v488_v32  ;;  %v502_v35 = vrot.slane %v1575_v33, 7  ;;  %vm492_vm13 = vcmp.gt.f32.partialorder %v488_v32, 0.0 }
 0x390   :  { %v1578_v13 = vsel %vm493_vm12, %v489_v30, %v497_v9  ;;  %v503_v37 = vrot.slane %v1580_v34, 7  ;;  %v514_v48 = vrot.slane %v1575_v33, 1  ;;  %v515_v49 = vrot.slane %v1580_v34, 1 }
 0x391   :  { %v505_v20 = vrot.slane %v1578_v13, 7  ;;  %v1589_v40 = vsel %vm492_vm13, %v488_v32, %v496_v24  ;;  %v517_v8 = vrot.slane %v1578_v13, 1 }
 0x392   :  { %v508_v43 = vsel %vm157_vm2, %v502_v35, %v503_v37  ;;  %v504_v44 = vrot.slane %v1589_v40, 7  ;;  %v520_v56 = vsel %vm178_vm0, %v514_v48, %v515_v49  ;;  %v516_v1 = vrot.slane %v1589_v40, 1 }
 0x393   :  { %v509_v36 = vsel %vm157_vm2, %v505_v20, %v502_v35  ;;  %v521_v12 = vsel %vm178_vm0, %v517_v8, %v514_v48 }
 0x394   :  { %1042 = vmatmul.mubr.msk.f32.vlgmr.msra.gmra.mxu1 %vm1460_vm3, %v509_v36  ;;  %v506_v53 = vsel %vm157_vm2, %v504_v44, %v505_v20  ;;  %v519_v10 = vsel %vm178_vm0, %v515_v49, %v516_v1  ;;  %v518_v11 = vsel %vm178_vm0, %v516_v1, %v517_v8 }
 0x395   :  { %1127 = vmatpush3.msra.mxu1 %v1545_v39  ;;  %643 = vmatprep.mubr.f32.mxu1 %v1580_v34  ;;  %v507_v39 = vsel %vm157_vm2, %v503_v37, %v504_v44 }
 0x396   :  { %1128 = vmatprep.subr.mxu1 %v572_v38 }
 0x397   :  { %1129 = vmatpush3.msra.mxu1 %v572_v38 }
 0x398   :  { %1130 = vmatprep.subr.mxu1 %v571_v42  ;;  %644 = vmatmul.mubr.f32.gmra.mxu1 %v508_v43 }
 0x399   :  { %1131 = vmatpush3.msra.mxu1 %v571_v42  ;;  %648 = vmatprep.mubr.f32.mxu1 %v1589_v40 }
 0x39a   :  { %1132 = vmatprep.subr.mxu1 %v570_v46 }
 0x39b   :  { %1133 = vmatpush3.msra.mxu1 %v570_v46 }
 0x39c   :  { %1134 = vmatprep.subr.mxu1 %v569_v41  ;;  %1043 = vmatmul.mubr.msk.f32.gmra.mxu1 %vm1483_vm5, %v507_v39 }
 0x39d   :  { %1135 = vmatpush3.msra.mxu1 %v569_v41  ;;  %653 = vmatprep.mubr.f32.mxu1 %v1578_v13 }
 0x39e   :  { %1136 = vmatprep.subr.mxu1 %v568_v47 }
 0x39f   :  { %1137 = vmatpush3.msra.mxu1 %v568_v47 }
 0x3a0   :  { %1138 = vmatprep.subr.mxu1 %v567_v50  ;;  %654 = vmatmul.mubr.f32.gmra.mxu1 %v506_v53 }
 0x3a1   :  { %1139 = vmatpush3.msra.mxu1 %v567_v50  ;;  %1158 = vmatprep.mubr.f32.mxu1 %v520_v56 }
 0x3a2   :  { %1140 = vmatprep.subr.mxu1 %v566_v55 }
 0x3a3   :  { %1141 = vmatpush3.msra.mxu1 %v566_v55 }
 0x3a4   :  { %1142 = vmatprep.subr.mxu1 %v565_v58 }
 0x3a5   :  { %1143 = vmatpush3.msra.mxu1 %v565_v58 }
 0x3a6   :  { %1144 = vmatprep.subr.mxu1 %v564_v54 }
 0x3a7   :  { %1145 = vmatpush3.msra.mxu1 %v564_v54 }
 0x3a8   :  { %1146 = vmatprep.subr.mxu1 %v563_v59 }
 0x3a9   :  { %1147 = vmatpush3.msra.mxu1 %v563_v59 }
 0x3aa   :  { %1148 = vmatprep.subr.mxu1 %v562_v60 }
 0x3ab   :  { %1149 = vmatpush3.msra.mxu1 %v562_v60 }
 0x3ac   :  { %1150 = vmatprep.subr.mxu1 %v561_v61 }
 0x3ad   :  { %1151 = vmatpush3.msra.mxu1 %v561_v61 }
 0x3ae   :  { %1152 = vmatprep.subr.mxu1 %v560_v62 }
 0x3af   :  { %1153 = vmatpush3.msra.mxu1 %v560_v62 }
 0x3b0   :  { %1154 = vmatprep.subr.mxu1 %v559_v0 }
 0x3b1   :  { %1155 = vmatpush3.msra.mxu1 %v559_v0 }
 0x3b2   :  { %1156 = vmatprep.subr.mxu1 %v558_v5 }
 0x3b3   :  { %1157 = vmatpush3.msra.mxu1 %v558_v5 }
 0x3b4   :  { %1159 = vmatmul.mubr.msk.f32.vlgmr.msra.gmra.mxu1 %vm1468_vm4, %v519_v10 }
 0x3b5   :  { %1161 = vmatprep.mubr.f32.mxu1 %v518_v11  ;;  %v901_v11 = vld [vmem:[#allocation8 + $0x38] sm:$0xff] }
 0x3b6   :  { %1164 = vmatprep.subr.mxu0 %v901_v11 }
 0x3b7   :  { %1165 = vmatpush3.msra.mxu0 %v901_v11 }
 0x3b8   :  { %1162 = vmatmul.mubr.msk.f32.gmra.mxu1 %vm1497_vm6, %v521_v12  ;;  %v900_v12 = vld [vmem:[#allocation8 + $0x30] sm:$0xff] }
 0x3b9   :  { %1166 = vmatprep.subr.mxu0 %v900_v12 }
 0x3ba   :  { %1167 = vmatpush3.msra.mxu0 %v900_v12 }
 0x454   :  { %v1082_v14 = vpop.f32.mrf.mxu1 }
 0x456   :  { %v1083_v15 = vpop.f32.mrf.mxu1 }
 0x457   :  { %v1084_v23 = vadd.f32 %v1083_v15, %v1082_v14  ;;  %v899_v14 = vld [vmem:[#allocation8 + $0x28] sm:$0xff]  ;;  %v898_v15 = vld [vmem:[#allocation8 + $0x20] sm:$0xff] }
 0x458   :  { %v1085_v16 = vpop.f32.mrf.mxu1  ;;  %1168 = vmatprep.subr.mxu0 %v899_v14 }
 0x459   :  { %1169 = vmatpush3.msra.mxu0 %v899_v14 }
 0x45a   :  { %v1086_v17 = vpop.f32.mrf.mxu1  ;;  %1170 = vmatprep.subr.mxu0 %v898_v15 }
 0x45b   :  { %v1087_v45 = vadd.f32 %v1086_v17, %v1085_v16  ;;  %v897_v16 = vld [vmem:[#allocation8 + $0x18] sm:$0xff]  ;;  %1171 = vmatpush3.msra.mxu0 %v898_v15 }
 0x45c   :  { %v1088_v18 = vpop.f32.mrf.mxu1  ;;  %1172 = vmatprep.subr.mxu0 %v897_v16 }
 0x45d   :  { %1173 = vmatpush3.msra.mxu0 %v897_v16 }
 0x45e   :  { %v1089_v19 = vpop.f32.mrf.mxu1 }
 0x45f   :  { %v1090_v29 = vadd.f32 %v1089_v19, %v1088_v18  ;;  %v896_v18 = vld [vmem:[#allocation8 + $0x10] sm:$0xff] }
 0x460   :  { %v1091_v2 = vpop.f32.mrf.mxu1  ;;  %1174 = vmatprep.subr.mxu0 %v896_v18 }
 0x461   :  { %1175 = vmatpush3.msra.mxu0 %v896_v18 }
 0x462   :  { %v1092_v21 = vpop.f32.mrf.mxu1 }
 0x463   :  { %v1093_v27 = vadd.f32 %v1092_v21, %v1091_v2  ;;  %v895_v2 = vld [vmem:[#allocation8 + $0x8] sm:$0xff]  ;;  %v894_v21 = vld [vmem:[#allocation8] sm:$0xff] }
 0x464   :  { %1176 = vmatprep.subr.mxu0 %v895_v2 }
 0x465   :  { %1177 = vmatpush3.msra.mxu0 %v895_v2 }
 0x466   :  { %1178 = vmatprep.subr.mxu0 %v894_v21 }
 0x467   :  { %1179 = vmatpush3.msra.mxu0 %v894_v21 }
 0x468   :  { %1181 = vmatmul.mubr.msk.f32.vlgmr.msra.gmra.mxu0 %vm211_vm1, %v1412_v6 }
 0x469   :  { %1183 = vmatprep.mubr.msk.f32.mxu0 %vm211_vm1, %v1404_v3  ;;  %v807_v3 = vsub.s32 2, %v1406_v4 }
 0x46c   :  { %1184 = vmatmul.mubr.msk.f32.gmra.mxu0 %vm211_vm1, %v1414_v7  ;;  %v808_v7 = vrot.slane %v1552_v52, %v807_v3 }
 0x474   :  { %v1160_v22 = vpop.f32.mrf.mxu1 }
 0x475   :  { %v1620_v25 = vadd.f32 %v1160_v22, %v1087_v45 }
 0x476   :  { %v725_v26 = vpop.f32.mrf.mxu1 }
 0x477   :  { %v1622_v28 = vadd.f32 %v1084_v23, %v725_v26  ;;  %v759_v30 = vmul.f32 %v1620_v25, %v1620_v25 }
 0x478   :  { %v1163_v63 = vpop.f32.mrf.mxu1 }
 0x479   :  { %v744_v31 = vadd.f32 %v1620_v25, %v1622_v28  ;;  %v758_v32 = vmul.f32 %v1622_v28, %v1622_v28  ;;  %v1630_v33 = vadd.f32 %v1163_v63, %v1093_v27 }
 0x47a   :  { %v735_v9 = vpop.f32.mrf.mxu1 }
 0x47b   :  { %v745_v13 = vrot.slane %v744_v31, 4  ;;  %v762_v34 = vadd.f32 %v759_v30, %v758_v32  ;;  %v1632_v24 = vadd.f32 %v1090_v29, %v735_v9  ;;  %v761_v35 = vmul.f32 %v1630_v33, %v1630_v33 }
 0x47c   :  { %v816_v9 = vsub.s32 3, %v1406_v4 }
 0x47d   :  { %v746_v20 = vadd.f32 %v745_v13, %v744_v31  ;;  %v763_v36 = vrot.slane %v762_v34, 4  ;;  %v751_v37 = vadd.f32 %v1630_v33, %v1632_v24  ;;  %v760_v38 = vmul.f32 %v1632_v24, %v1632_v24 }
 0x47f   :  { %v747_v40 = vrot.slane %v746_v20, 2  ;;  %v764_v42 = vadd.f32 %v763_v36, %v762_v34  ;;  %v752_v43 = vrot.slane %v751_v37, 4  ;;  %v769_v44 = vadd.f32 %v761_v35, %v760_v38 }
 0x480   :  { %v817_v35 = vrot.slane %v1552_v52, %v816_v9 }
 0x481   :  { %v765_v46 = vrot.slane %v764_v42, 2  ;;  %v753_v41 = vadd.f32 %v752_v43, %v751_v37  ;;  %v770_v39 = vrot.slane %v769_v44, 4  ;;  %v748_v47 = vadd.f32 %v747_v40, %v746_v20 }
 0x483   :  { %v754_v48 = vrot.slane %v753_v41, 2  ;;  %v771_v49 = vadd.f32 %v770_v39, %v769_v44  ;;  %v766_v50 = vadd.f32 %v765_v46, %v764_v42  ;;  %v749_v56 = vrot.slane %v748_v47, 1 }
 0x484   :  { %v904_v46 = vsub.s32 4, %v1406_v4 }
 0x485   :  { %v755_v53 = vadd.f32 %v754_v48, %v753_v41  ;;  %v772_v55 = vrot.slane %v771_v49, 2  ;;  %v767_v54 = vrot.slane %v766_v50, 1  ;;  %v750_v62 = vadd.f32 %v749_v56, %v748_v47 }
 0x487   :  { %v756_v58 = vrot.slane %v755_v53, 1  ;;  %v773_v59 = vadd.f32 %v772_v55, %v771_v49  ;;  %v768_v0 = vadd.f32 %v767_v54, %v766_v50 }
 0x489   :  { %v757_v60 = vadd.f32 %v756_v58, %v755_v53  ;;  %v774_v61 = vrot.slane %v773_v59, 1  ;;  %v905_v53 = vrot.slane %v1552_v52, %v904_v46 }
 0x48b   :  { %v775_v1 = vadd.f32 %v774_v61, %v773_v59  ;;  %v778_v5 = vsel %vm371_vm7, %v757_v60, %v750_v62 }
 0x48d   :  { %v782_v8 = vsel %vm376_vm8, %v775_v1, %v768_v0 }
 0x48e   :  { %v784_v10 = vsel %vm379_vm9, %v778_v5, %v782_v8 }
 0x48f   :  { %785 = vrot.lane.b32.xlu0 %v784_v10, %s1334_s24 }
 0x501   :  { %v786_v17 = vpop.permute.xlu0 %785 }
 0x502   :  { %v787_v19 = vadd.f32 %v786_v17, %v784_v10 }
 0x504   :  { %788 = vrot.lane.b32.xlu1 %v787_v19, %s1340_s4 }
 0x528   :  { %v1182_v37 = vpop.f32.mrf.mxu0 }
 0x529   :  { %v986_v62 = vadd.f32 %v1182_v37, %v905_v53 }
 0x52a   :  { %v980_v41 = vpop.f32.mrf.mxu0 }
 0x52b   :  { %v981_v1 = vadd.f32 %v980_v41, %v905_v53 }
 0x52c   :  { %v1185_v55 = vpop.f32.mrf.mxu0 }
 0x52d   :  { %v996_v14 = vadd.f32 %v1185_v55, %v905_v53 }
 0x52e   :  { %v990_v5 = vpop.f32.mrf.mxu0 }
 0x52f   :  { %v991_v16 = vadd.f32 %v990_v5, %v905_v53 }
 0x576   :  { %v789_v45 = vpop.permute.xlu1 %788 }
 0x577   :  { %v790_v22 = vadd.f32 %v789_v45, %v787_v19 }
 0x579   :  { %791 = vrot.lane.b32.xlu0 %v790_v22, %s1341_s17 }
 0x5eb   :  { %v792_v23 = vpop.permute.xlu0 %791 }
 0x5ec   :  { %v793_v26 = vadd.f32 %v792_v23, %v790_v22 }
 0x5ee   :  { %794 = vrot.lane.b32.xlu1 %v793_v26, %s1339_s2 }
 0x660   :  { %v795_v27 = vpop.permute.xlu1 %794 }
 0x661   :  { %v796_v29 = vadd.f32 %v795_v27, %v793_v26 }
 0x663   :  { %v797_v63 = vmul.f32 0.00390625, %v796_v29 }
 0x665   :  { %v798_v30 = vmul.f32 %v797_v63, %v797_v63 }
 0x667   :  { %v800_v31 = vrot.slane %v798_v30, 6 }
 0x669   :  { %v802_v6 = vsub.f32 %v797_v63, %v800_v31 }
 0x66b   :  { %v803_v32 = vadd.f32 1e-05, %v802_v6 }
 0x66d   :  { %1201 = vrsqrt.f32 %v803_v32 }
 0x67a   :  { %v1202_v13 = vpop.eup %1201 }
 0x67b   :  { %v809_v34 = vmul.f32 %v1202_v13, %v808_v7 }
 0x67d   :  { %v811_v20 = vrot.slane %v809_v34, 2  ;;  %v825_v36 = vrot.slane %v809_v34, %v1558_v57 }
 0x67f   :  { %v813_v38 = vmul.f32 %v811_v20, %v797_v63  ;;  %v833_v40 = vrot.slane %v825_v36, %v1558_v57  ;;  %v826_v42 = vcombine.high %v825_v36, %v825_v36 }
 0x681   :  { %v818_v43 = vsub.f32 %v817_v35, %v813_v38  ;;  %v841_v44 = vcombine.high %v833_v40, %v833_v40  ;;  %v840_v39 = vrot.slane %v826_v42, %v1558_v57 }
 0x683   :  { %v864_v47 = vrot.slane %v818_v43, %v1558_v57  ;;  %v846_v48 = vrot.slane %v841_v44, %v1550_v51  ;;  %v842_v49 = vcombine.high %v840_v39, %v840_v39 }
 0x685   :  { %v872_v50 = vrot.slane %v864_v47, %v1558_v57  ;;  %v850_v56 = vrot.slane %v842_v49, %v1550_v51  ;;  %v865_v58 = vcombine.high %v864_v47, %v864_v47  ;;  %v854_v54 = vmul.f32 %v846_v48, %v1620_v25 }
 0x686   :  { %v853_v59 = vmul.f32 %v846_v48, %v1622_v28 }
 0x687   :  { %v883_v4 = vrot.slane %v872_v50, %v1550_v51  ;;  %v879_v60 = vrot.slane %v865_v58, %v1558_v57  ;;  %v856_v8 = vmul.f32 %v850_v56, %v1630_v33  ;;  %v855_v10 = vmul.f32 %v850_v56, %v1632_v24 }
 0x689   :  { %v891_v61 = vadd.f32 %v883_v4, %v854_v54  ;;  %v890_v0 = vadd.f32 %v883_v4, %v853_v59  ;;  %v887_v52 = vrot.slane %v879_v60, %v1550_v51 }
 0x68b   :  { %v1000_v11 = vadd.f32 %v986_v62, %v891_v61  ;;  %v999_v12 = vadd.f32 %v981_v1, %v890_v0  ;;  %v893_v25 = vadd.f32 %v887_v52, %v856_v8  ;;  %v892_v15 = vadd.f32 %v887_v52, %v855_v10 }
 0x68d   :  { %vm1004_vm14 = vcmp.gt.f32.partialorder %v1000_v11, 0.0  ;;  %v1008_v28 = vmul.f32 0.01, %v1000_v11  ;;  %vm1003_vm15 = vcmp.gt.f32.partialorder %v999_v12, 0.0  ;;  %v1007_v57 = vmul.f32 0.01, %v999_v12 }
 0x68e   :  { %v1002_v17 = vadd.f32 %v996_v14, %v893_v25  ;;  %v1001_v18 = vadd.f32 %v991_v16, %v892_v15 }
 0x68f   :  { %v1012_v19 = vsel %vm1004_vm14, %v1000_v11, %v1008_v28  ;;  %v1011_v33 = vsel %vm1003_vm15, %v999_v12, %v1007_v57 }
 0x690   :  { %1016 = vst [vmem:[#allocation11 + $0x8] sm:$0xff] %v1012_v19  ;;  %1015 = vst [vmem:[#allocation11] sm:$0xff] %v1011_v33  ;;  %vm1006_vm0 = vcmp.gt.f32.partialorder %v1002_v17, 0.0  ;;  %v1010_v51 = vmul.f32 0.01, %v1002_v17  ;;  %vm1005_vm1 = vcmp.gt.f32.partialorder %v1001_v18, 0.0 }
 0x691   :  { %v1009_v24 = vmul.f32 0.01, %v1001_v18 }
 0x692   :  { %v1014_v2 = vsel %vm1006_vm0, %v1002_v17, %v1010_v51 }
 0x693   :  { %v1013_v21 = vsel %vm1005_vm1, %v1001_v18, %v1009_v24  ;;  %1018 = vst [vmem:[#allocation11 + $0x18] sm:$0xff] %v1014_v2 }
 0x694   :  { %1017 = vst [vmem:[#allocation11 + $0x10] sm:$0xff] %v1013_v21 }
 0x695   :  { %1314 = shalt.err (!%p1311_p1)
}
 0x696   :  { %1030 = dma.vmem_to_hbm [thread:$0]  %s1025_s19, 512, %s1684_s5, [#allocation4], %s1333_s23, %s1333_s23, %s1334_s24  }
 0x697   :  { %1329 = dma.done.wait [#allocation4], 512  }
 0x698   :  { %1330 = vsyncadd [#allocation4], 4294966784 }
 0x699   :  { %1034 = vsyncpa [#allocation3], 1 }
 0x69a   :  { %1035 = vsyncpa [#allocation6], 1 }
 0x69b   :  { %1036 = vsyncpa [#allocation9], 1 }
 0x69c   :  { %1037 = vsyncpa [#allocation4], 1 }

</bundles_post_ra>
